<compile_context>
chip_gen: v6e
topology: v6e:2x2x1
jax: 0.10.0
libtpu: 0.0.40
codegen_flags: <defaults>
</compile_context>

<pallas_src>
import functools

import jax
import jax.numpy as jnp
from jax.experimental import pallas as pl
from jax.experimental.pallas import tpu as pltpu

_LANE = 128


def _round_up(n, m):
    return ((n + m - 1) // m) * m


def _tpu_config():
    """(use_bf16_tanh, num_tensorcores) derived from the local device kind."""
    try:
        kind = jax.devices()[0].device_kind.lower()
    except Exception:  # no devices / interpret mode
        kind = ""
    bf16_eup = ("v6" in kind) or ("v7" in kind)     # v5e/v4 have no bf16 EUP/VPU
    num_cores = 2 if "v7" in kind else 1            # v7x: 2 TensorCores per chip
    return bf16_eup, num_cores


def mlp_kernel(x_ref,
               w1_ref, t1_ref,
               w2_ref, t2_ref,
               w3_ref, t3_ref,
               w4_ref, b4_ref,
               o_ref, *, act_dtype):
    """Whole forward pass for one batch tile, feature-major / batch-on-lanes.

    x_ref:  (D, tile)   bf16
    w{l}:   (out, in)   bf16   (BN folded in)
    t{l}:   (out, 1)    f32    (folded BN shift + bias)
    o_ref:  (1, tile)   f32
    """
    h = x_ref[...]                                                  # (D, tile) bf16
    for w_ref, t_ref in ((w1_ref, t1_ref), (w2_ref, t2_ref), (w3_ref, t3_ref)):
        a = jnp.dot(w_ref[...], h, preferred_element_type=jnp.float32)   # (out, tile) f32
        a = (a + t_ref[...]).astype(act_dtype)      # bias add in f32, then cast
        h = jnp.tanh(a).astype(jnp.bfloat16)        # no-op cast when act_dtype==bf16

    # output layer: (1,32) @ (32,tile) -> (1,tile); lane-dense store.
    z = jnp.dot(w4_ref[...], h, preferred_element_type=jnp.float32)
    o_ref[...] = jax.nn.sigmoid(z + b4_ref[...])


def _choose_tile(B, tile_b, num_cores):
    """Batch tile (multiple of 128 lanes)."""
    B_lane = _round_up(B, _LANE)
    tile = min(max(_LANE, (tile_b // _LANE) * _LANE), B_lane)
    if num_cores > 1 and B >= 512 and B_lane // tile < 2:
        # v7x: guarantee >= 2 tiles so both TensorCores get work.
        tile = max(_LANE, _round_up(B_lane // 2, _LANE))
    return tile


def net_forward_pallas(x, fp, *, tile_b=4096):
    """x: (B, D) f32/bf16.  fp: folded params (bf16 weights, f32 shifts).  -> (B, 1) f32."""
    B, D = x.shape
    bf16_eup, num_cores = _tpu_config()
    act_dtype = jnp.bfloat16 if bf16_eup else jnp.float32

    tile = _choose_tile(B, tile_b, num_cores)
    B_pad = _round_up(B, tile)
    num_tiles = B_pad // tile

    # Feature-major layout: batch on the lane axis; bf16 halves the dominant HBM read.
    xT = x.astype(jnp.bfloat16).T                                   # (D, B)
    if B_pad != B:
        xT = jnp.pad(xT, ((0, 0), (0, B_pad - B)))

    w1t, t1 = fp["w1t"], fp["t1"]
    w2t, t2 = fp["w2t"], fp["t2"]
    w3t, t3 = fp["w3t"], fp["t3"]
    w4t, b4 = fp["w4t"], fp["b4"]

    def full(arr):  # grid-invariant operand: constant block index, no per-step re-DMA
        return pl.BlockSpec(arr.shape, lambda i: (0, 0))

    param_bytes = sum(int(v.size) * v.dtype.itemsize for v in fp.values())
    cost = pl.CostEstimate(
        flops=int(2 * B_pad * (D * 128 + 128 * 64 + 64 * 32 + 32 * 1)),
        transcendentals=int(B_pad * (128 + 64 + 32 + 1)),
        bytes_accessed=int(2 * B_pad * D + param_bytes + 4 * B_pad),
    )

    kernel = functools.partial(mlp_kernel, act_dtype=act_dtype)

    out = pl.pallas_call(
        kernel,
        out_shape=jax.ShapeDtypeStruct((1, B_pad), jnp.float32),
        grid_spec=pltpu.PrefetchScalarGridSpec(
            num_scalar_prefetch=0,
            grid=(num_tiles,),
            in_specs=[
                pl.BlockSpec((D, tile), lambda i: (0, i)),   # x batch tile (lanes)
                full(w1t), full(t1),
                full(w2t), full(t2),
                full(w3t), full(t3),
                full(w4t), full(b4),
            ],
            out_specs=pl.BlockSpec((1, tile), lambda i: (0, i)),  # lane-dense outputs
        ),
        compiler_params=pltpu.CompilerParams(
            dimension_semantics=("parallel",),
            vmem_limit_bytes=32 * 1024 * 1024,
        ),
        cost_estimate=cost,
    )(xT, w1t, t1, w2t, t2, w3t, t3, w4t, b4)

    # (1, B_pad) lane-dense -> (B, 1), dropping the padded tail.
    return out[0, :B].reshape(B, 1)


def init_params(key, input_shape):
    """Deterministic parameter init mimicking the PyTorch module's shapes (f32)."""
    dims = [(input_shape, 128), (128, 64), (64, 32), (32, 1)]
    keys = jax.random.split(key, 16)
    params = {}
    eps = 1e-5
    ki = 0
    for li, (fan_in, fan_out) in enumerate(dims, start=1):
        bound = 1.0 / jnp.sqrt(jnp.float32(fan_in))
        w = jax.random.uniform(keys[ki], (fan_in, fan_out), jnp.float32,
                               -bound, bound); ki += 1
        b = jax.random.uniform(keys[ki], (1, fan_out), jnp.float32,
                               -bound, bound); ki += 1
        params[f"w{li}"] = w
        params[f"b{li}"] = b
        if li < 4:
            # BatchNorm1d (eval mode): deterministic, non-trivial running stats.
            gamma = 1.0 + 0.1 * jax.random.normal(keys[ki], (1, fan_out)); ki += 1
            beta = 0.1 * jax.random.normal(keys[ki], (1, fan_out)); ki += 1
            rmean = 0.05 * jnp.arange(fan_out, dtype=jnp.float32)[None, :]
            rvar = 1.0 + 0.01 * jnp.arange(fan_out, dtype=jnp.float32)[None, :]
            scale = gamma / jnp.sqrt(rvar + eps)
            shift = beta - rmean * scale
            params[f"s{li}"] = scale.astype(jnp.float32)
            params[f"t{li}"] = shift.astype(jnp.float32)
    return params


def fold_params(p):
    """Fold eval-mode BatchNorm into the linears; transpose for the feature-major kernel."""
    fp = {}
    for l in (1, 2, 3):
        w = p[f"w{l}"] * p[f"s{l}"]                      # (in, out) * (1, out)
        t = p[f"b{l}"] * p[f"s{l}"] + p[f"t{l}"]         # (1, out)
        fp[f"w{l}t"] = w.T.astype(jnp.bfloat16)          # (out, in)
        fp[f"t{l}"] = t.T.astype(jnp.float32)            # (out, 1)
    fp["w4t"] = p["w4"].T.astype(jnp.bfloat16)           # (1, 32)
    fp["b4"] = p["b4"].astype(jnp.float32)               # (1, 1)
    return fp


def net_forward_ref(x_bf16, fp):
    """Pure-JAX f32 reference on the same (dequantized) folded parameters."""
    h = x_bf16.astype(jnp.float32)                       # (B, D)
    for l in (1, 2, 3):
        w = fp[f"w{l}t"].astype(jnp.float32)             # (out, in)
        t = fp[f"t{l}"].astype(jnp.float32)              # (out, 1)
        h = jnp.tanh(h @ w.T + t.T)
    w4 = fp["w4t"].astype(jnp.float32)                   # (1, 32)
    return jax.nn.sigmoid(h @ w4.T + fp["b4"])


if __name__ == "__main__":
    key = jax.random.PRNGKey(0)
    k_x, k_p = jax.random.split(key)

    batch, input_shape = 8, 32
    x = jax.random.normal(k_x, (batch, input_shape), dtype=jnp.float32)
    params = init_params(k_p, input_shape)
    fp = fold_params(params)

    out = net_forward_pallas(x, fp)
    out = jax.block_until_ready(out)

    ref = net_forward_ref(x.astype(jnp.bfloat16), fp)
    assert out.shape == (batch, 1)
    # bf16 weight/activation storage (and bf16 tanh on v6e/v7x) -> loosened tolerance.
    assert jnp.allclose(out, ref, atol=2e-2, rtol=2e-2), "mismatch vs reference"

    print("KERNEL_OK")
</pallas_src>

<mosaic_0001>
module attributes {stable_mosaic.version = 11 : i64} {
  func.func @mlp_kernel(%arg0: i32, %arg1: memref<32x128xbf16, #tpu.memory_space<vmem>>, %arg2: memref<128x32xbf16, #tpu.memory_space<vmem>>, %arg3: memref<128x1xf32, #tpu.memory_space<vmem>>, %arg4: memref<64x128xbf16, #tpu.memory_space<vmem>>, %arg5: memref<64x1xf32, #tpu.memory_space<vmem>>, %arg6: memref<32x64xbf16, #tpu.memory_space<vmem>>, %arg7: memref<32x1xf32, #tpu.memory_space<vmem>>, %arg8: memref<1x32xbf16, #tpu.memory_space<vmem>>, %arg9: memref<1x1xf32, #tpu.memory_space<vmem>>, %arg10: memref<1x128xf32, #tpu.memory_space<vmem>>) attributes {dimension_semantics = [#tpu.dimension_semantics<parallel>], iteration_bounds = array<i64: 1>, scalar_prefetch = 0 : i64, scratch_operands = 0 : i64, tpu.core_type = #tpu.core_type<tc>, window_params = [{transform_indices = @transform_0, window_bounds = array<i64: 32, 128>}, {pipeline_mode = #tpu.pipeline_mode<synchronous>, transform_indices = @transform_1, window_bounds = array<i64: 128, 32>}, {pipeline_mode = #tpu.pipeline_mode<synchronous>, transform_indices = @transform_2, window_bounds = array<i64: 128, 1>}, {pipeline_mode = #tpu.pipeline_mode<synchronous>, transform_indices = @transform_3, window_bounds = array<i64: 64, 128>}, {pipeline_mode = #tpu.pipeline_mode<synchronous>, transform_indices = @transform_4, window_bounds = array<i64: 64, 1>}, {pipeline_mode = #tpu.pipeline_mode<synchronous>, transform_indices = @transform_5, window_bounds = array<i64: 32, 64>}, {pipeline_mode = #tpu.pipeline_mode<synchronous>, transform_indices = @transform_6, window_bounds = array<i64: 32, 1>}, {pipeline_mode = #tpu.pipeline_mode<synchronous>, transform_indices = @transform_7, window_bounds = array<i64: 1, 32>}, {pipeline_mode = #tpu.pipeline_mode<synchronous>, transform_indices = @transform_8, window_bounds = array<i64: 1, 1>}, {transform_indices = @transform_9, window_bounds = array<i64: 1, 128>}]} {
    %c0 = arith.constant 0 : index
    %c0_0 = arith.constant 0 : index
    %0 = vector.load %arg1[%c0, %c0_0] : memref<32x128xbf16, #tpu.memory_space<vmem>>, vector<32x128xbf16>
    %c0_1 = arith.constant 0 : index
    %c0_2 = arith.constant 0 : index
    %1 = vector.load %arg2[%c0_1, %c0_2] : memref<128x32xbf16, #tpu.memory_space<vmem>>, vector<128x32xbf16>
    %cst = arith.constant dense<0.000000e+00> : vector<128x128xf32>
    %2 = tpu.matmul %1, %0, %cst {dimension_numbers = #tpu.dot_dimension_numbers<[1], [0], [0], [1], [0, 0, 1, 1], [], []>} : vector<128x32xbf16>, vector<32x128xbf16>, vector<128x128xf32> -> vector<128x128xf32>
    %c0_3 = arith.constant 0 : index
    %c0_4 = arith.constant 0 : index
    %3 = vector.load %arg3[%c0_3, %c0_4] : memref<128x1xf32, #tpu.memory_space<vmem>>, vector<128x1xf32>
    %4 = vector.broadcast %3 : vector<128x1xf32> to vector<128x128xf32>
    %5 = arith.addf %2, %4 : vector<128x128xf32>
    %6 = math.tanh %5 : vector<128x128xf32>
    %7 = arith.truncf %6 : vector<128x128xf32> to vector<128x128xbf16>
    %c0_5 = arith.constant 0 : index
    %c0_6 = arith.constant 0 : index
    %8 = vector.load %arg4[%c0_5, %c0_6] : memref<64x128xbf16, #tpu.memory_space<vmem>>, vector<64x128xbf16>
    %cst_7 = arith.constant dense<0.000000e+00> : vector<64x128xf32>
    %9 = tpu.matmul %8, %7, %cst_7 {dimension_numbers = #tpu.dot_dimension_numbers<[1], [0], [0], [1], [0, 0, 1, 1], [], []>} : vector<64x128xbf16>, vector<128x128xbf16>, vector<64x128xf32> -> vector<64x128xf32>
    %c0_8 = arith.constant 0 : index
    %c0_9 = arith.constant 0 : index
    %10 = vector.load %arg5[%c0_8, %c0_9] : memref<64x1xf32, #tpu.memory_space<vmem>>, vector<64x1xf32>
    %11 = vector.broadcast %10 : vector<64x1xf32> to vector<64x128xf32>
    %12 = arith.addf %9, %11 : vector<64x128xf32>
    %13 = math.tanh %12 : vector<64x128xf32>
    %14 = arith.truncf %13 : vector<64x128xf32> to vector<64x128xbf16>
    %c0_10 = arith.constant 0 : index
    %c0_11 = arith.constant 0 : index
    %15 = vector.load %arg6[%c0_10, %c0_11] : memref<32x64xbf16, #tpu.memory_space<vmem>>, vector<32x64xbf16>
    %cst_12 = arith.constant dense<0.000000e+00> : vector<32x128xf32>
    %16 = tpu.matmul %15, %14, %cst_12 {dimension_numbers = #tpu.dot_dimension_numbers<[1], [0], [0], [1], [0, 0, 1, 1], [], []>} : vector<32x64xbf16>, vector<64x128xbf16>, vector<32x128xf32> -> vector<32x128xf32>
    %c0_13 = arith.constant 0 : index
    %c0_14 = arith.constant 0 : index
    %17 = vector.load %arg7[%c0_13, %c0_14] : memref<32x1xf32, #tpu.memory_space<vmem>>, vector<32x1xf32>
    %18 = vector.broadcast %17 : vector<32x1xf32> to vector<32x128xf32>
    %19 = arith.addf %16, %18 : vector<32x128xf32>
    %20 = math.tanh %19 : vector<32x128xf32>
    %21 = arith.truncf %20 : vector<32x128xf32> to vector<32x128xbf16>
    %c0_15 = arith.constant 0 : index
    %c0_16 = arith.constant 0 : index
    %22 = vector.load %arg8[%c0_15, %c0_16] : memref<1x32xbf16, #tpu.memory_space<vmem>>, vector<1x32xbf16>
    %cst_17 = arith.constant dense<0.000000e+00> : vector<1x128xf32>
    %23 = tpu.matmul %22, %21, %cst_17 {dimension_numbers = #tpu.dot_dimension_numbers<[1], [0], [0], [1], [0, 0, 1, 1], [], []>} : vector<1x32xbf16>, vector<32x128xbf16>, vector<1x128xf32> -> vector<1x128xf32>
    %c0_18 = arith.constant 0 : index
    %c0_19 = arith.constant 0 : index
    %24 = vector.load %arg9[%c0_18, %c0_19] : memref<1x1xf32, #tpu.memory_space<vmem>>, vector<1x1xf32>
    %25 = vector.broadcast %24 : vector<1x1xf32> to vector<1x128xf32>
    %26 = arith.addf %23, %25 : vector<1x128xf32>
    %27 = arith.negf %26 : vector<1x128xf32>
    %28 = math.exp %27 : vector<1x128xf32>
    %cst_20 = arith.constant 1.000000e+00 : f32
    %29 = vector.broadcast %cst_20 : f32 to vector<1x128xf32>
    %30 = arith.addf %29, %28 : vector<1x128xf32>
    %31 = arith.divf %29, %30 : vector<1x128xf32>
    %c0_21 = arith.constant 0 : index
    %c0_22 = arith.constant 0 : index
    %32 = vector.load %arg10[%c0_21, %c0_22] : memref<1x128xf32, #tpu.memory_space<vmem>>, vector<1x128xf32>
    tpu.vector_store %arg10[%c0_21, %c0_22], %31 {strides = array<i32>} : memref<1x128xf32, #tpu.memory_space<vmem>>, vector<1x128xf32>,
    return
  }
  func.func @transform_0(%arg0: i32) -> (i32, i32) {
    %c0_i32 = arith.constant 0 : i32
    %c0_i32_0 = arith.constant 0 : i32
    return %c0_i32, %arg0 : i32, i32
  }
  func.func @transform_1(%arg0: i32) -> (i32, i32) {
    %c0_i32 = arith.constant 0 : i32
    %c0_i32_0 = arith.constant 0 : i32
    %c0_i32_1 = arith.constant 0 : i32
    return %c0_i32, %c0_i32_0 : i32, i32
  }
  func.func @transform_2(%arg0: i32) -> (i32, i32) {
    %c0_i32 = arith.constant 0 : i32
    %c0_i32_0 = arith.constant 0 : i32
    %c0_i32_1 = arith.constant 0 : i32
    return %c0_i32, %c0_i32_0 : i32, i32
  }
  func.func @transform_3(%arg0: i32) -> (i32, i32) {
    %c0_i32 = arith.constant 0 : i32
    %c0_i32_0 = arith.constant 0 : i32
    %c0_i32_1 = arith.constant 0 : i32
    return %c0_i32, %c0_i32_0 : i32, i32
  }
  func.func @transform_4(%arg0: i32) -> (i32, i32) {
    %c0_i32 = arith.constant 0 : i32
    %c0_i32_0 = arith.constant 0 : i32
    %c0_i32_1 = arith.constant 0 : i32
    return %c0_i32, %c0_i32_0 : i32, i32
  }
  func.func @transform_5(%arg0: i32) -> (i32, i32) {
    %c0_i32 = arith.constant 0 : i32
    %c0_i32_0 = arith.constant 0 : i32
    %c0_i32_1 = arith.constant 0 : i32
    return %c0_i32, %c0_i32_0 : i32, i32
  }
  func.func @transform_6(%arg0: i32) -> (i32, i32) {
    %c0_i32 = arith.constant 0 : i32
    %c0_i32_0 = arith.constant 0 : i32
    %c0_i32_1 = arith.constant 0 : i32
    return %c0_i32, %c0_i32_0 : i32, i32
  }
  func.func @transform_7(%arg0: i32) -> (i32, i32) {
    %c0_i32 = arith.constant 0 : i32
    %c0_i32_0 = arith.constant 0 : i32
    %c0_i32_1 = arith.constant 0 : i32
    return %c0_i32, %c0_i32_0 : i32, i32
  }
  func.func @transform_8(%arg0: i32) -> (i32, i32) {
    %c0_i32 = arith.constant 0 : i32
    %c0_i32_0 = arith.constant 0 : i32
    %c0_i32_1 = arith.constant 0 : i32
    return %c0_i32, %c0_i32_0 : i32, i32
  }
  func.func @transform_9(%arg0: i32) -> (i32, i32) {
    %c0_i32 = arith.constant 0 : i32
    %c0_i32_0 = arith.constant 0 : i32
    return %c0_i32, %arg0 : i32, i32
  }
}

</mosaic_0001>

<bundles_post_ra>
// kernel: tpu_custom_call.1
= control target key start
LH: loop header
LB: loop body
LE: loop exit
PB: predicated region body
PF: predicated region fallthrough
CT: control target
= control target key end

     0   :  { %s1124_s0 = inlined_call_operand.vmem [shape: bf16[32,128], index: 0, kind: input, shape index: {}]   ;;  %s1125_s1 = inlined_call_operand.vmem [shape: bf16[128,32], index: 1, kind: input, shape index: {}]   ;;  %s1126_s2 = inlined_call_operand.vmem [shape: f32[128,1], index: 2, kind: input, shape index: {}]   ;;  %s1127_s3 = inlined_call_operand.vmem [shape: bf16[64,128], index: 3, kind: input, shape index: {}]   ;;  %s1128_s4 = inlined_call_operand.vmem [shape: f32[64,1], index: 4, kind: input, shape index: {}]   ;;  %s1129_s5 = inlined_call_operand.vmem [shape: bf16[32,64], index: 5, kind: input, shape index: {}]   ;;  %s1130_s6 = inlined_call_operand.vmem [shape: f32[32,1], index: 6, kind: input, shape index: {}]   ;;  %s1131_s7 = inlined_call_operand.vmem [shape: bf16[1,32], index: 7, kind: input, shape index: {}]   ;;  %s1132_s8 = inlined_call_operand.<no memory space> [shape: f32[1,1], index: 8, kind: input, shape index: {}]   ;;  %s1133_s9 = inlined_call_operand.hbm [shape: f32[1,128], index: 9, kind: output, shape index: {}]  }
   0x1   :  { %v14_v0 = vstv %s1132_s8 }
   0x2   :  { %15 = vst [vmem:[#allocation2] sm:$0x1] %v14_v0 }
   0x3   :  { %v811_v1 = vld [vmem:[%s1124_s0 + $0x8] sm:$0xff]   ;;  %vm204_vm0 = vcmask 261120   ;;  %v812_v2 = vld [vmem:[%s1124_s0] sm:$0xff]   ;;  %v909_v4 = vmov 0   ;;  %v815_v6 = vld [vmem:[%s1125_s1 + $0x10] sm:$0xff]  }
   0x4   :  { %741 = vmatprep.subr.bf16.mxu0 %v811_v1  ;;  %v813_v3 = vld [vmem:[%s1125_s1] sm:$0xff]   ;;  %809 = vset.pattern.permute.xlu0 %v909_v4  ;;  %v814_v5 = vld [vmem:[%s1125_s1 + $0x8] sm:$0xff]   ;;  %v70_v7 = vld [vmem:[%s1126_s2 + $0x70] sm:$0xff] }
   0x5   :  { %742 = vmatpush3.bf16.msra.mxu0 %v811_v1  ;;  %810 = vset.pattern.permute.xlu1 %v909_v4  ;;  %v68_v8 = vld [vmem:[%s1126_s2 + $0x60] sm:$0xff]  ;;  %v71_v9 = vld [vmem:[%s1126_s2 + $0x78] sm:$0xff]  ;;  %v69_v10 = vld [vmem:[%s1126_s2 + $0x68] sm:$0xff] }
   0x6   :  { %743 = vmatprep.subr.bf16.mxu0 %v812_v2  ;;  %745 = vmatprep.mubr.msk.bf16.mxu0 %vm204_vm0, %v813_v3  ;;  %v816_v11 = vld [vmem:[%s1125_s1 + $0x18] sm:$0xff]   ;;  %v817_v12 = vld [vmem:[%s1125_s1 + $0x20] sm:$0xff]   ;;  %v66_v13 = vld [vmem:[%s1126_s2 + $0x50] sm:$0xff] }
   0x7   :  { %144 = vperm.xlu0 %809, %v70_v7   ;;  %134 = vperm.xlu1 %810, %v68_v8   ;;  %v67_v14 = vld [vmem:[%s1126_s2 + $0x58] sm:$0xff]  ;;  %v64_v15 = vld [vmem:[%s1126_s2 + $0x40] sm:$0xff]  ;;  %v65_v16 = vld [vmem:[%s1126_s2 + $0x48] sm:$0xff] }
   0x8   :  { %v818_v17 = vld [vmem:[%s1125_s1 + $0x28] sm:$0xff]   ;;  %v819_v18 = vld [vmem:[%s1125_s1 + $0x30] sm:$0xff]  }
   0x9   :  { %744 = vmatpush3.bf16.msra.mxu0 %v812_v2 }
   0xb   :  { %149 = vperm.xlu0 %809, %v71_v9   ;;  %139 = vperm.xlu1 %810, %v69_v10  }
   0xc   :  { %746 = vmatmul.mubr.msk.bf16.vlgmr.msra.gmra.mxu0 %vm204_vm0, %v814_v5 }
   0xd   :  { %749 = vmatprep.mubr.msk.bf16.mxu0 %vm204_vm0, %v815_v6 }
   0xf   :  { %124 = vperm.xlu0 %809, %v66_v13   ;;  %129 = vperm.xlu1 %810, %v67_v14  }
  0x13   :  { %114 = vperm.xlu0 %809, %v64_v15  }
  0x14   :  { %750 = vmatmul.mubr.msk.bf16.gmra.mxu0 %vm204_vm0, %v816_v11 }
  0x15   :  { %753 = vmatprep.mubr.msk.bf16.mxu0 %vm204_vm0, %v817_v12 }
  0x16   :  { %16 = vsyncpa [#allocation4], 0  ;;  %v62_v19 = vld [vmem:[%s1126_s2 + $0x30] sm:$0xff]  ;;  %119 = vperm.xlu1 %810, %v65_v16   ;;  %v63_v20 = vld [vmem:[%s1126_s2 + $0x38] sm:$0xff]  ;;  %vm545_vm1 = vcmask 523264   ;;  %vm911_vm2 = vmmov 0  }
  0x17   :  { %104 = vperm.xlu0 %809, %v62_v19   ;;  %v60_v21 = vld [vmem:[%s1126_s2 + $0x20] sm:$0xff]  ;;  %v61_v22 = vld [vmem:[%s1126_s2 + $0x28] sm:$0xff]  ;;  %v820_v23 = vld [vmem:[%s1125_s1 + $0x38] sm:$0xff]   ;;  %s912_s22 = smov [#allocation3]  }
  0x18   :  { %v58_v24 = vld [vmem:[%s1126_s2 + $0x10] sm:$0xff]  ;;  %v59_v25 = vld [vmem:[%s1126_s2 + $0x18] sm:$0xff]  ;;  %v56_v26 = vld [vmem:[%s1126_s2] sm:$0xff]  ;;  %s674_s23 = sshll.u32 %s912_s22, 4  ;;  %s675_s23 = int_to_ptr.vmem [resolvable:$true] %s674_s23 }
  0x19   :  { %v57_v27 = vld [vmem:[%s1126_s2 + $0x8] sm:$0xff]  ;;  %v364_v28 = vld [vmem:[%s1128_s4 + $0x30] sm:$0xff]  ;;  %v365_v29 = vld [vmem:[%s1128_s4 + $0x38] sm:$0xff]  ;;  %s891_s24 = scalar_lea.vmem %s675_s23, 32  ;;  %p892_p1 = scmp.lt.s32.totalorder %s675_s23, %s675_s23 }
  0x1a   :  { %109 = vperm.xlu1 %810, %v63_v20   ;;  %v362_v30 = vld [vmem:[%s1128_s4 + $0x20] sm:$0xff]  ;;  %v363_v31 = vld [vmem:[%s1128_s4 + $0x28] sm:$0xff]  ;;  %v360_v32 = vld [vmem:[%s1128_s4 + $0x10] sm:$0xff] }
  0x1b   :  { %94 = vperm.xlu0 %809, %v60_v21   ;;  %v361_v33 = vld [vmem:[%s1128_s4 + $0x18] sm:$0xff]  ;;  %v358_v34 = vld [vmem:[%s1128_s4] sm:$0xff]  ;;  %v359_v35 = vld [vmem:[%s1128_s4 + $0x8] sm:$0xff] }
  0x1c   :  { %754 = vmatmul.mubr.msk.bf16.gmra.mxu0 %vm204_vm0, %v818_v17  ;;  %v513_v36 = vld [vmem:[%s1130_s6 + $0x10] sm:$0xff]  ;;  %v514_v37 = vld [vmem:[%s1130_s6 + $0x18] sm:$0xff]  ;;  %v511_v38 = vld [vmem:[%s1130_s6] sm:$0xff] }
  0x1d   :  { %757 = vmatprep.mubr.msk.bf16.mxu0 %vm204_vm0, %v819_v18  ;;  %v512_v39 = vld [vmem:[%s1130_s6 + $0x8] sm:$0xff]  ;;  %v608_v40 = vld [vmem:[#allocation2] sm:$0x1] }
  0x1e   :  { %99 = vperm.xlu1 %810, %v61_v22   ;;  %v821_v41 = vld [vmem:[%s1127_s3] sm:$0xff]  }
  0x1f   :  { %84 = vperm.xlu0 %809, %v58_v24   ;;  %777 = vmatprep.mubr.bf16.mxu1 %v821_v41 }
  0x22   :  { %89 = vperm.xlu1 %810, %v59_v25  }
  0x23   :  { %74 = vperm.xlu0 %809, %v56_v26  }
  0x24   :  { %758 = vmatmul.mubr.msk.bf16.gmra.mxu0 %vm204_vm0, %v820_v23 }
  0x26   :  { %79 = vperm.xlu1 %810, %v57_v27  }
  0x27   :  { %398 = vperm.xlu0 %809, %v364_v28  }
  0x2a   :  { %403 = vperm.xlu1 %810, %v365_v29  }
  0x2b   :  { %388 = vperm.xlu0 %809, %v362_v30  }
  0x2e   :  { %393 = vperm.xlu1 %810, %v363_v31  }
  0x2f   :  { %378 = vperm.xlu0 %809, %v360_v32  }
  0x32   :  { %383 = vperm.xlu1 %810, %v361_v33  }
  0x33   :  { %368 = vperm.xlu0 %809, %v358_v34  }
  0x36   :  { %373 = vperm.xlu1 %810, %v359_v35  }
  0x37   :  { %527 = vperm.xlu0 %809, %v513_v36  }
  0x3a   :  { %532 = vperm.xlu1 %810, %v514_v37  }
  0x3b   :  { %517 = vperm.xlu0 %809, %v511_v38  }
  0x3e   :  { %522 = vperm.xlu1 %810, %v512_v39  }
  0x3f   :  { %611 = vperm.xlu0 %809, %v608_v40  }
  0x82   :  { %v135_v46 = vpop.permute.xlu1 %134  ;;  %v145_v48 = vpop.permute.xlu0 %144 }
  0x86   :  { %v140_v51 = vpop.permute.xlu1 %139  ;;  %v150_v53 = vpop.permute.xlu0 %149 }
  0x8a   :  { %v130_v56 = vpop.permute.xlu1 %129  ;;  %v125_v58 = vpop.permute.xlu0 %124 }
  0x8e   :  { %v115_v0 = vpop.permute.xlu0 %114 }
  0x91   :  { %v120_v61 = vpop.permute.xlu1 %119 }
  0x92   :  { %v105_v9 = vpop.permute.xlu0 %104 }
  0x95   :  { %v110_v7 = vpop.permute.xlu1 %109 }
  0x96   :  { %v95_v14 = vpop.permute.xlu0 %94 }
  0x99   :  { %v100_v12 = vpop.permute.xlu1 %99 }
  0x9a   :  { %v85_v24 = vpop.permute.xlu0 %84 }
  0x9d   :  { %v90_v19 = vpop.permute.xlu1 %89 }
  0x9e   :  { %v75_v34 = vpop.permute.xlu0 %74 }
  0xa1   :  { %v80_v30 = vpop.permute.xlu1 %79 }
  0xcc   :  { %v1091_v42 = vpop.f32.mrf.mxu0 }
  0xcd   :  { %v272_v28 = vadd.f32 %v1091_v42, %v85_v24 }
  0xce   :  { %v1093_v43 = vpop.f32.mrf.mxu0 }
  0xcf   :  { %v264_v35 = vadd.f32 %v1093_v43, %v75_v34 }
  0xd0   :  { %v748_v44 = vpop.f32.mrf.mxu0 }
  0xd1   :  { %v275_v25 = vadd.f32 %v748_v44, %v90_v19 }
  0xd2   :  { %v1095_v45 = vpop.f32.mrf.mxu0 }
  0xd3   :  { %v267_v31 = vadd.f32 %v1095_v45, %v80_v30 }
  0xd4   :  { %v751_v47 = vpop.f32.mrf.mxu0 }
  0xd5   :  { %v288_v15 = vadd.f32 %v751_v47, %v105_v9 }
  0xd6   :  { %v279_v49 = vpop.f32.mrf.mxu0 }
  0xd7   :  { %v280_v21 = vadd.f32 %v279_v49, %v95_v14 }
  0xd8   :  { %v752_v50 = vpop.f32.mrf.mxu0 }
  0xd9   :  { %v291_v13 = vadd.f32 %v752_v50, %v110_v7  ;;  %v822_v50 = vld [vmem:[%s1127_s3 + $0x8] sm:$0xff]  }
  0xda   :  { %v282_v52 = vpop.f32.mrf.mxu0 }
  0xdb   :  { %v283_v17 = vadd.f32 %v282_v52, %v100_v12  ;;  %v824_v52 = vld [vmem:[%s1127_s3 + $0x18] sm:$0xff]  }
  0xdc   :  { %v755_v54 = vpop.f32.mrf.mxu0 }
  0xdd   :  { %v304_v8 = vadd.f32 %v755_v54, %v125_v58  ;;  %v404_v54 = vpop.permute.xlu1 %403 }
  0xde   :  { %v295_v55 = vpop.f32.mrf.mxu0 }
  0xdf   :  { %v296_v11 = vadd.f32 %v295_v55, %v115_v0 }
  0xe0   :  { %v756_v57 = vpop.f32.mrf.mxu0 }
  0xe1   :  { %v307_v5 = vadd.f32 %v756_v57, %v130_v56  ;;  %v399_v56 = vpop.permute.xlu0 %398 }
  0xe2   :  { %v298_v59 = vpop.f32.mrf.mxu0 }
  0xe3   :  { %v299_v10 = vadd.f32 %v298_v59, %v120_v61  ;;  %v394_v59 = vpop.permute.xlu1 %393 }
  0xe4   :  { %v759_v60 = vpop.f32.mrf.mxu0 }
  0xe5   :  { %v320_v62 = vadd.f32 %v759_v60, %v145_v48  ;;  %v389_v61 = vpop.permute.xlu0 %388 }
  0xe6   :  { %v311_v63 = vpop.f32.mrf.mxu0 }
  0xe7   :  { %v312_v1 = vadd.f32 %v311_v63, %v135_v46  ;;  %827 = vtanh.f32 %v320_v62 }
  0xe8   :  { %v760_v2 = vpop.f32.mrf.mxu0 }
  0xe9   :  { %v323_v3 = vadd.f32 %v760_v2, %v150_v53  ;;  %v825_v53 = vld [vmem:[%s1129_s5] sm:$0xff]  }
  0xea   :  { %v314_v4 = vpop.f32.mrf.mxu0  ;;  %793 = vmatprep.mubr.msk.bf16.mxu0 %vm545_vm1, %v825_v53 }
  0xeb   :  { %829 = vtanh.f32 %v323_v3  ;;  %v315_v6 = vadd.f32 %v314_v4, %v140_v51  ;;  %v823_v51 = vld [vmem:[%s1127_s3 + $0x10] sm:$0xff]  }
  0xec   :  { %831 = vtanh.f32 %v312_v1  ;;  %v384_v1 = vpop.permute.xlu1 %383 }
  0xed   :  { %833 = vtanh.f32 %v315_v6 }
  0xee   :  { %835 = vtanh.f32 %v307_v5  ;;  %v379_v5 = vpop.permute.xlu0 %378 }
  0xef   :  { %837 = vtanh.f32 %v304_v8 }
  0xf0   :  { %839 = vtanh.f32 %v299_v10  ;;  %v374_v10 = vpop.permute.xlu1 %373 }
  0xf1   :  { %841 = vtanh.f32 %v296_v11 }
  0xf2   :  { %843 = vtanh.f32 %v291_v13  ;;  %v369_v12 = vpop.permute.xlu0 %368 }
  0xf3   :  { %845 = vtanh.f32 %v288_v15 }
  0xf4   :  { %v828_v16 = vpop.eup %827  ;;  %847 = vtanh.f32 %v283_v17 }
  0xf5   :  { %849 = vtanh.f32 %v280_v21 }
  0xf6   :  { %851 = vtanh.f32 %v275_v25 }
  0xf7   :  { %853 = vtanh.f32 %v272_v28  ;;  %v528_v28 = vpop.permute.xlu0 %527 }
  0xf8   :  { %v830_v18 = vpop.eup %829  ;;  %855 = vtanh.f32 %v267_v31 }
  0xf9   :  { %v832_v20 = vpop.eup %831  ;;  %v349_v22 = vpack.c.bf16 %v830_v18, %v828_v16  ;;  %857 = vtanh.f32 %v264_v35 }
  0xfa   :  { %v834_v23 = vpop.eup %833 }
  0xfb   :  { %761 = vmatprep.subr.bf16.mxu1 %v349_v22  ;;  %v348_v26 = vpack.c.bf16 %v834_v23, %v832_v20  ;;  %v836_v27 = vpop.eup %835  ;;  %v518_v34 = vpop.permute.xlu0 %517 }
  0xfc   :  { %762 = vmatpush3.bf16.msra.mxu1 %v349_v22  ;;  %v838_v29 = vpop.eup %837 }
  0xfd   :  { %763 = vmatprep.subr.bf16.mxu1 %v348_v26  ;;  %v347_v32 = vpack.c.bf16 %v836_v27, %v838_v29  ;;  %v840_v33 = vpop.eup %839  ;;  %v910_v27 = vmov 0.0   ;;  %v533_v29 = vpop.permute.xlu1 %532 }
  0xfe   :  { %v842_v36 = vpop.eup %841 }
  0xff   :  { %v346_v37 = vpack.c.bf16 %v840_v33, %v842_v36  ;;  %v844_v38 = vpop.eup %843 }
 0x100   :  { %764 = vmatpush3.bf16.msra.mxu1 %v348_v26  ;;  %v846_v39 = vpop.eup %845  ;;  %v826_v26 = vld [vmem:[%s1129_s5 + $0x8] sm:$0xff]  }
 0x101   :  { %765 = vmatprep.subr.bf16.mxu1 %v347_v32  ;;  %v345_v40 = vpack.c.bf16 %v844_v38, %v846_v39  ;;  %v848_v41 = vpop.eup %847  ;;  %v523_v36 = vpop.permute.xlu1 %522 }
 0x102   :  { %v850_v42 = vpop.eup %849 }
 0x103   :  { %v344_v44 = vpack.c.bf16 %v848_v41, %v850_v42  ;;  %v852_v45 = vpop.eup %851 }
 0x104   :  { %766 = vmatpush3.bf16.msra.mxu1 %v347_v32  ;;  %v854_v46 = vpop.eup %853 }
 0x105   :  { %767 = vmatprep.subr.bf16.mxu1 %v346_v37  ;;  %v343_v43 = vpack.c.bf16 %v852_v45, %v854_v46  ;;  %v856_v47 = vpop.eup %855 }
 0x106   :  { %v858_v48 = vpop.eup %857 }
 0x107   :  { %v342_v49 = vpack.c.bf16 %v856_v47, %v858_v48  ;;  %v614_v47 = vlaneseq }
 0x108   :  { %768 = vmatpush3.bf16.msra.mxu1 %v346_v37 }
 0x109   :  { %769 = vmatprep.subr.bf16.mxu1 %v345_v40  ;;  %v615_v48 = vshrl.u32 %v614_v47, 7 }
 0x10c   :  { %770 = vmatpush3.bf16.msra.mxu1 %v345_v40 }
 0x10d   :  { %771 = vmatprep.subr.bf16.mxu1 %v344_v44 }
 0x110   :  { %772 = vmatpush3.bf16.msra.mxu1 %v344_v44 }
 0x111   :  { %773 = vmatprep.subr.bf16.mxu1 %v343_v43 }
 0x114   :  { %774 = vmatpush3.bf16.msra.mxu1 %v343_v43  ;;  %v607_v43 = vld [vmem:[%s1131_s7] sm:$0x1]  ;;  %s887_s7 = scalar_lea.vmem %s675_s23, 16 }
 0x115   :  { %775 = vmatprep.subr.bf16.mxu1 %v342_v49  ;;  %p888_p0 = scmp.ne.s32.totalorder %s675_s23, %s887_s7  ;;  %p893_p2 = scmp.lt.s32.totalorder %s891_s24, %s887_s7 }
 0x117   :  { %p894_p3 = por %p893_p2, %p892_p1 }
 0x118   :  { %776 = vmatpush3.bf16.msra.mxu1 %v342_v49  ;;  %v616_v49 = vsub.s32 0, %v615_v48 }
 0x119   :  { %p895_p4 = pnand %p894_p3, %p888_p0 }
 0x11b   :  { %778 = vmatmul.mubr.bf16.vlgmr.msra.gmra.mxu1 %v822_v50  ;;  %v612_v50 = vpop.permute.xlu0 %611 }
 0x11c   :  { %781 = vmatprep.mubr.bf16.mxu1 %v823_v51  ;;  %v617_v51 = vrot.slane %v612_v50, %v616_v49 }
 0x123   :  { %782 = vmatmul.mubr.bf16.gmra.mxu1 %v824_v52 }
 0x1db   :  { %v779_v55 = vpop.f32.mrf.mxu1 }
 0x1dc   :  { %v473_v9 = vadd.f32 %v779_v55, %v379_v5 }
 0x1dd   :  { %v464_v57 = vpop.f32.mrf.mxu1 }
 0x1de   :  { %v465_v13 = vadd.f32 %v464_v57, %v369_v12 }
 0x1df   :  { %v780_v58 = vpop.f32.mrf.mxu1 }
 0x1e0   :  { %v476_v7 = vadd.f32 %v780_v58, %v384_v1 }
 0x1e1   :  { %v467_v60 = vpop.f32.mrf.mxu1 }
 0x1e2   :  { %v468_v11 = vadd.f32 %v467_v60, %v374_v10 }
 0x1e3   :  { %v783_v62 = vpop.f32.mrf.mxu1 }
 0x1e4   :  { %v489_v63 = vadd.f32 %v783_v62, %v399_v56 }
 0x1e5   :  { %v480_v0 = vpop.f32.mrf.mxu1 }
 0x1e6   :  { %v481_v2 = vadd.f32 %v480_v0, %v389_v61  ;;  %859 = vtanh.f32 %v489_v63 }
 0x1e7   :  { %v784_v3 = vpop.f32.mrf.mxu1 }
 0x1e8   :  { %v492_v4 = vadd.f32 %v784_v3, %v404_v54 }
 0x1e9   :  { %v483_v6 = vpop.f32.mrf.mxu1 }
 0x1ea   :  { %861 = vtanh.f32 %v492_v4  ;;  %v484_v8 = vadd.f32 %v483_v6, %v394_v59 }
 0x1eb   :  { %863 = vtanh.f32 %v481_v2 }
 0x1ec   :  { %865 = vtanh.f32 %v484_v8 }
 0x1ed   :  { %867 = vtanh.f32 %v476_v7 }
 0x1ee   :  { %869 = vtanh.f32 %v473_v9 }
 0x1ef   :  { %871 = vtanh.f32 %v468_v11 }
 0x1f0   :  { %873 = vtanh.f32 %v465_v13 }
 0x1f3   :  { %v860_v14 = vpop.eup %859 }
 0x1f7   :  { %v862_v15 = vpop.eup %861 }
 0x1f8   :  { %v864_v16 = vpop.eup %863  ;;  %v506_v17 = vpack.c.bf16 %v862_v15, %v860_v14 }
 0x1f9   :  { %v866_v18 = vpop.eup %865 }
 0x1fa   :  { %785 = vmatprep.subr.bf16.mxu0 %v506_v17  ;;  %v505_v19 = vpack.c.bf16 %v866_v18, %v864_v16  ;;  %v868_v20 = vpop.eup %867 }
 0x1fb   :  { %786 = vmatpush3.bf16.msra.mxu0 %v506_v17  ;;  %v870_v21 = vpop.eup %869 }
 0x1fc   :  { %787 = vmatprep.subr.bf16.mxu0 %v505_v19  ;;  %v504_v22 = vpack.c.bf16 %v868_v20, %v870_v21  ;;  %v872_v23 = vpop.eup %871 }
 0x1fd   :  { %v874_v24 = vpop.eup %873 }
 0x1fe   :  { %v503_v25 = vpack.c.bf16 %v872_v23, %v874_v24 }
 0x1ff   :  { %788 = vmatpush3.bf16.msra.mxu0 %v505_v19 }
 0x200   :  { %789 = vmatprep.subr.bf16.mxu0 %v504_v22 }
 0x203   :  { %790 = vmatpush3.bf16.msra.mxu0 %v504_v22 }
 0x204   :  { %791 = vmatprep.subr.bf16.mxu0 %v503_v25 }
 0x207   :  { %792 = vmatpush3.bf16.msra.mxu0 %v503_v25 }
 0x208   :  { %797 = vmatprep.subr.bf16.mxu0 %v910_v27 }
 0x20a   :  { %794 = vmatmul.mubr.msk.bf16.vlgmr.msra.gmra.mxu0 %vm545_vm1, %v826_v26 }
 0x20b   :  { %801 = vmatprep.mubr.msk.bf16.mxu0 %vm911_vm2, %v910_v27 }
 0x2ca   :  { %v795_v30 = vpop.f32.mrf.mxu0 }
 0x2cb   :  { %v595_v31 = vadd.f32 %v795_v30, %v528_v28 }
 0x2cc   :  { %v586_v32 = vpop.f32.mrf.mxu0 }
 0x2cd   :  { %875 = vtanh.f32 %v595_v31  ;;  %v587_v38 = vadd.f32 %v586_v32, %v518_v34 }
 0x2ce   :  { %v796_v33 = vpop.f32.mrf.mxu0 }
 0x2cf   :  { %v598_v35 = vadd.f32 %v796_v33, %v533_v29 }
 0x2d0   :  { %v589_v37 = vpop.f32.mrf.mxu0 }
 0x2d1   :  { %877 = vtanh.f32 %v598_v35  ;;  %v590_v39 = vadd.f32 %v589_v37, %v523_v36 }
 0x2d3   :  { %879 = vtanh.f32 %v590_v39 }
 0x2d4   :  { %881 = vtanh.f32 %v587_v38 }
 0x2da   :  { %v876_v40 = vpop.eup %875 }
 0x2de   :  { %v878_v41 = vpop.eup %877 }
 0x2df   :  { %v606_v42 = vpack.c.bf16 %v878_v41, %v876_v40 }
 0x2e0   :  { %v880_v44 = vpop.eup %879 }
 0x2e1   :  { %798 = vmatpush3.bf16.msra.mxu0 %v606_v42  ;;  %v882_v45 = vpop.eup %881 }
 0x2e2   :  { %799 = vmatprep.subr.bf16.mxu0 %v910_v27  ;;  %v605_v46 = vpack.c.bf16 %v880_v44, %v882_v45 }
 0x2e5   :  { %800 = vmatpush3.bf16.msra.mxu0 %v605_v46 }
 0x2e8   :  { %802 = vmatmul.mubr.msk.bf16.vlgmr.msra.gmra.mxu0 %vm204_vm0, %v607_v43 }
 0x3a8   :  { %v655_v52 = vpop.f32.mrf.mxu0 }
 0x3a9   :  { %v656_v53 = vadd.f32 %v655_v52, %v617_v51 }
 0x3aa   :  { %v803_v54 = vpop.f32.mrf.mxu0 }
 0x3ab   :  { %v709_v55 = vmul.f32 -1.442695, %v656_v53 }
 0x3ac   :  { %v658_v56 = vpop.f32.mrf.mxu0 }
 0x3ad   :  { %883 = vpow2.f32 %v709_v55 }
 0x3ae   :  { %v804_v57 = vpop.f32.mrf.mxu0 }
 0x3ba   :  { %v884_v58 = vpop.eup %883 }
 0x3bb   :  { %v664_v59 = vadd.f32 1.0, %v884_v58 }
 0x3bd   :  { %885 = vrcp.f32 %v664_v59 }
 0x3ca   :  { %v886_v60 = vpop.eup %885 }
 0x3cb   :  { %667 = vst [vmem:[#allocation3] sm:$0x1] %v886_v60 }
 0x3cc   :  { %898 = shalt.err (!%p895_p4)
}
 0x3cd   :  { %677 = dma.vmem_to_hbm [thread:$0]  %s675_s23, 16, %s1133_s9, [#allocation4]  }
 0x3ce   :  { %907 = dma.done.wait [#allocation4], 16  }
 0x3cf   :  { %908 = vsyncadd [#allocation4], 4294967280 }
 0x3d0   :  { %681 = vsyncpa [#allocation4], 1 }

</bundles_post_ra>
